<compile_context>
chip_gen: v7x
topology: tpu7x:2x2x1
jax: 0.10.0
libtpu: 0.0.40
codegen_flags: <defaults>
</compile_context>

<pallas_src>
import jax
import jax.numpy as jnp
from jax.experimental import pallas as pl
from jax.experimental.pallas import tpu as pltpu


def _round_up(n, m):
    return ((n + m - 1) // m) * m


def feedforward_kernel(x_ref, w1_ref, b1_ref, w2_ref, b2_ref, o_ref):
    # x_ref: (3, TILE_B) VMEM tile, feature-major (batch on the lane axis).
    # w1_ref (2,3), b1_ref (2,), w2_ref (3,2), b2_ref (3,): SMEM scalars
    # (PyTorch nn.Linear layout: weight is (out_features, in_features)).
    x0 = x_ref[0:1, :]                     # (1, TILE_B)
    x1 = x_ref[1:2, :]
    x2 = x_ref[2:3, :]

    # Layer 1: h_j = sigmoid(sum_k W1[j,k] * x_k + b1[j]) — 6 VPU FMAs + EUP.
    h0 = jax.nn.sigmoid(x0 * w1_ref[0, 0] + x1 * w1_ref[0, 1]
                        + x2 * w1_ref[0, 2] + b1_ref[0])
    h1 = jax.nn.sigmoid(x0 * w1_ref[1, 0] + x1 * w1_ref[1, 1]
                        + x2 * w1_ref[1, 2] + b1_ref[1])

    # Layer 2: y_j = sum_k W2[j,k] * h_k + b2[j] — 6 VPU FMAs, lane-dense stores.
    o_ref[0:1, :] = h0 * w2_ref[0, 0] + h1 * w2_ref[0, 1] + b2_ref[0]
    o_ref[1:2, :] = h0 * w2_ref[1, 0] + h1 * w2_ref[1, 1] + b2_ref[1]
    o_ref[2:3, :] = h0 * w2_ref[2, 0] + h1 * w2_ref[2, 1] + b2_ref[2]


def feedforward(x, w1, b1, w2, b2, *, tile_b=65536):
    """x: (B, 3) f32 -> (B, 3) f32.

    Weights use the PyTorch layout: w1 (2, 3), b1 (2,), w2 (3, 2), b2 (3,).
    The wrapper handles the feature-major transpose and pads B up to a
    multiple of the batch tile (128-aligned for the lane axis).
    """
    B, f_in = x.shape
    assert f_in == 3
    lane = 128
    tile_b = _round_up(min(tile_b, _round_up(B, lane)), lane)
    b_pad = _round_up(B, tile_b)
    grid = (b_pad // tile_b,)

    # Feature-major, lane-dense slab: (3, B_pad). Padding lanes are zeros and
    # are sliced off after the kernel.
    xt = jnp.pad(x.T, ((0, 0), (0, b_pad - B)))

    smem = pl.BlockSpec(memory_space=pltpu.MemorySpace.SMEM)
    yt = pl.pallas_call(
        feedforward_kernel,
        out_shape=jax.ShapeDtypeStruct((3, b_pad), x.dtype),
        grid=grid,
        in_specs=[
            pl.BlockSpec((3, tile_b), lambda i: (0, i)),   # x: tiled over batch
            smem,                                          # w1 (resident)
            smem,                                          # b1
            smem,                                          # w2
            smem,                                          # b2
        ],
        out_specs=pl.BlockSpec((3, tile_b), lambda i: (0, i)),
        compiler_params=pltpu.CompilerParams(
            dimension_semantics=("parallel",),
            vmem_limit_bytes=32 << 20,   # headroom for large tiles on all gens
        ),
    )(xt, w1, b1, w2, b2)
    return yt[:, :B].T


def init_params(key):
    """Deterministic PyTorch-style init: U(-1/sqrt(fan_in), 1/sqrt(fan_in))."""
    k1, k2, k3, k4 = jax.random.split(key, 4)
    bound1 = 1.0 / jnp.sqrt(3.0)   # linear1 fan_in = 3
    bound2 = 1.0 / jnp.sqrt(2.0)   # linear2 fan_in = 2
    # PyTorch nn.Linear layout: weight (out_features, in_features), bias (out,)
    w1 = jax.random.uniform(k1, (2, 3), jnp.float32, -bound1, bound1)
    b1 = jax.random.uniform(k2, (2,), jnp.float32, -bound1, bound1)
    w2 = jax.random.uniform(k3, (3, 2), jnp.float32, -bound2, bound2)
    b2 = jax.random.uniform(k4, (3,), jnp.float32, -bound2, bound2)
    return w1, b1, w2, b2


if __name__ == "__main__":
    key = jax.random.PRNGKey(0)
    kx, kp = jax.random.split(key)
    w1, b1, w2, b2 = init_params(kp)

    def reference(x):
        # Pure-JAX reference of the PyTorch forward: x @ W1.T + b1 -> sigmoid -> @ W2.T + b2
        return jax.nn.sigmoid(x @ w1.T + b1) @ w2.T + b2

    # Primary small check (B=8, single tile) + a multi-tile / padded-batch check.
    for B, tile_b in ((8, 65536), (200, 128)):
        x = jax.random.normal(kx, (B, 3), jnp.float32)
        out = jax.block_until_ready(feedforward(x, w1, b1, w2, b2, tile_b=tile_b))
        assert out.shape == (B, 3)
        assert jnp.allclose(out, reference(x), atol=1e-5, rtol=1e-5)

    print("KERNEL_OK")
</pallas_src>

<mosaic_0001>
module attributes {stable_mosaic.version = 11 : i64} {
  func.func @feedforward_kernel(%arg0: i32, %arg1: memref<3x128xf32, #tpu.memory_space<vmem>>, %arg2: memref<2x3xf32, #tpu.memory_space<smem>>, %arg3: memref<2xf32, #tpu.memory_space<smem>>, %arg4: memref<3x2xf32, #tpu.memory_space<smem>>, %arg5: memref<3xf32, #tpu.memory_space<smem>>, %arg6: memref<3x128xf32, #tpu.memory_space<vmem>>) attributes {dimension_semantics = [#tpu.dimension_semantics<parallel>], iteration_bounds = array<i64: 1>, scalar_prefetch = 0 : i64, scratch_operands = 0 : i64, tpu.core_type = #tpu.core_type<tc>, window_params = [{transform_indices = @transform_0, window_bounds = array<i64: 3, 128>}, {transform_indices = @transform_1, window_bounds = array<i64: 2, 3>}, {transform_indices = @transform_2, window_bounds = array<i64: 2>}, {transform_indices = @transform_3, window_bounds = array<i64: 3, 2>}, {transform_indices = @transform_4, window_bounds = array<i64: 3>}, {transform_indices = @transform_5, window_bounds = array<i64: 3, 128>}]} {
    %c0 = arith.constant 0 : index
    %c0_0 = arith.constant 0 : index
    %0 = vector.load %arg1[%c0, %c0_0] : memref<3x128xf32, #tpu.memory_space<vmem>>, vector<1x128xf32>
    %c1 = arith.constant 1 : index
    %c0_1 = arith.constant 0 : index
    %1 = vector.load %arg1[%c1, %c0_1] : memref<3x128xf32, #tpu.memory_space<vmem>>, vector<1x128xf32>
    %c2 = arith.constant 2 : index
    %c0_2 = arith.constant 0 : index
    %2 = vector.load %arg1[%c2, %c0_2] : memref<3x128xf32, #tpu.memory_space<vmem>>, vector<1x128xf32>
    %c0_3 = arith.constant 0 : index
    %c0_4 = arith.constant 0 : index
    %3 = memref.load %arg2[%c0_3, %c0_4] : memref<2x3xf32, #tpu.memory_space<smem>>
    %4 = vector.broadcast %3 : f32 to vector<1x128xf32>
    %5 = arith.mulf %0, %4 : vector<1x128xf32>
    %c0_5 = arith.constant 0 : index
    %c1_6 = arith.constant 1 : index
    %6 = memref.load %arg2[%c0_5, %c1_6] : memref<2x3xf32, #tpu.memory_space<smem>>
    %7 = vector.broadcast %6 : f32 to vector<1x128xf32>
    %8 = arith.mulf %1, %7 : vector<1x128xf32>
    %9 = arith.addf %5, %8 : vector<1x128xf32>
    %c0_7 = arith.constant 0 : index
    %c2_8 = arith.constant 2 : index
    %10 = memref.load %arg2[%c0_7, %c2_8] : memref<2x3xf32, #tpu.memory_space<smem>>
    %11 = vector.broadcast %10 : f32 to vector<1x128xf32>
    %12 = arith.mulf %2, %11 : vector<1x128xf32>
    %13 = arith.addf %9, %12 : vector<1x128xf32>
    %c0_9 = arith.constant 0 : index
    %14 = memref.load %arg3[%c0_9] : memref<2xf32, #tpu.memory_space<smem>>
    %15 = vector.broadcast %14 : f32 to vector<1x128xf32>
    %16 = arith.addf %13, %15 : vector<1x128xf32>
    %17 = arith.negf %16 : vector<1x128xf32>
    %18 = math.exp %17 : vector<1x128xf32>
    %cst = arith.constant 1.000000e+00 : f32
    %19 = vector.broadcast %cst : f32 to vector<1x128xf32>
    %20 = arith.addf %19, %18 : vector<1x128xf32>
    %21 = arith.divf %19, %20 : vector<1x128xf32>
    %c1_10 = arith.constant 1 : index
    %c0_11 = arith.constant 0 : index
    %22 = memref.load %arg2[%c1_10, %c0_11] : memref<2x3xf32, #tpu.memory_space<smem>>
    %23 = vector.broadcast %22 : f32 to vector<1x128xf32>
    %24 = arith.mulf %0, %23 : vector<1x128xf32>
    %c1_12 = arith.constant 1 : index
    %c1_13 = arith.constant 1 : index
    %25 = memref.load %arg2[%c1_12, %c1_13] : memref<2x3xf32, #tpu.memory_space<smem>>
    %26 = vector.broadcast %25 : f32 to vector<1x128xf32>
    %27 = arith.mulf %1, %26 : vector<1x128xf32>
    %28 = arith.addf %24, %27 : vector<1x128xf32>
    %c1_14 = arith.constant 1 : index
    %c2_15 = arith.constant 2 : index
    %29 = memref.load %arg2[%c1_14, %c2_15] : memref<2x3xf32, #tpu.memory_space<smem>>
    %30 = vector.broadcast %29 : f32 to vector<1x128xf32>
    %31 = arith.mulf %2, %30 : vector<1x128xf32>
    %32 = arith.addf %28, %31 : vector<1x128xf32>
    %c1_16 = arith.constant 1 : index
    %33 = memref.load %arg3[%c1_16] : memref<2xf32, #tpu.memory_space<smem>>
    %34 = vector.broadcast %33 : f32 to vector<1x128xf32>
    %35 = arith.addf %32, %34 : vector<1x128xf32>
    %36 = arith.negf %35 : vector<1x128xf32>
    %37 = math.exp %36 : vector<1x128xf32>
    %cst_17 = arith.constant 1.000000e+00 : f32
    %38 = vector.broadcast %cst_17 : f32 to vector<1x128xf32>
    %39 = arith.addf %38, %37 : vector<1x128xf32>
    %40 = arith.divf %38, %39 : vector<1x128xf32>
    %c0_18 = arith.constant 0 : index
    %c0_19 = arith.constant 0 : index
    %41 = memref.load %arg4[%c0_18, %c0_19] : memref<3x2xf32, #tpu.memory_space<smem>>
    %42 = vector.broadcast %41 : f32 to vector<1x128xf32>
    %43 = arith.mulf %21, %42 : vector<1x128xf32>
    %c0_20 = arith.constant 0 : index
    %c1_21 = arith.constant 1 : index
    %44 = memref.load %arg4[%c0_20, %c1_21] : memref<3x2xf32, #tpu.memory_space<smem>>
    %45 = vector.broadcast %44 : f32 to vector<1x128xf32>
    %46 = arith.mulf %40, %45 : vector<1x128xf32>
    %47 = arith.addf %43, %46 : vector<1x128xf32>
    %c0_22 = arith.constant 0 : index
    %48 = memref.load %arg5[%c0_22] : memref<3xf32, #tpu.memory_space<smem>>
    %49 = vector.broadcast %48 : f32 to vector<1x128xf32>
    %50 = arith.addf %47, %49 : vector<1x128xf32>
    %c0_23 = arith.constant 0 : index
    %c0_24 = arith.constant 0 : index
    %51 = vector.load %arg6[%c0_23, %c0_24] : memref<3x128xf32, #tpu.memory_space<vmem>>, vector<1x128xf32>
    tpu.vector_store %arg6[%c0_23, %c0_24], %50 {strides = array<i32>} : memref<3x128xf32, #tpu.memory_space<vmem>>, vector<1x128xf32>,
    %c1_25 = arith.constant 1 : index
    %c0_26 = arith.constant 0 : index
    %52 = memref.load %arg4[%c1_25, %c0_26] : memref<3x2xf32, #tpu.memory_space<smem>>
    %53 = vector.broadcast %52 : f32 to vector<1x128xf32>
    %54 = arith.mulf %21, %53 : vector<1x128xf32>
    %c1_27 = arith.constant 1 : index
    %c1_28 = arith.constant 1 : index
    %55 = memref.load %arg4[%c1_27, %c1_28] : memref<3x2xf32, #tpu.memory_space<smem>>
    %56 = vector.broadcast %55 : f32 to vector<1x128xf32>
    %57 = arith.mulf %40, %56 : vector<1x128xf32>
    %58 = arith.addf %54, %57 : vector<1x128xf32>
    %c1_29 = arith.constant 1 : index
    %59 = memref.load %arg5[%c1_29] : memref<3xf32, #tpu.memory_space<smem>>
    %60 = vector.broadcast %59 : f32 to vector<1x128xf32>
    %61 = arith.addf %58, %60 : vector<1x128xf32>
    %c1_30 = arith.constant 1 : index
    %c0_31 = arith.constant 0 : index
    %62 = vector.load %arg6[%c1_30, %c0_31] : memref<3x128xf32, #tpu.memory_space<vmem>>, vector<1x128xf32>
    tpu.vector_store %arg6[%c1_30, %c0_31], %61 {strides = array<i32>} : memref<3x128xf32, #tpu.memory_space<vmem>>, vector<1x128xf32>,
    %c2_32 = arith.constant 2 : index
    %c0_33 = arith.constant 0 : index
    %63 = memref.load %arg4[%c2_32, %c0_33] : memref<3x2xf32, #tpu.memory_space<smem>>
    %64 = vector.broadcast %63 : f32 to vector<1x128xf32>
    %65 = arith.mulf %21, %64 : vector<1x128xf32>
    %c2_34 = arith.constant 2 : index
    %c1_35 = arith.constant 1 : index
    %66 = memref.load %arg4[%c2_34, %c1_35] : memref<3x2xf32, #tpu.memory_space<smem>>
    %67 = vector.broadcast %66 : f32 to vector<1x128xf32>
    %68 = arith.mulf %40, %67 : vector<1x128xf32>
    %69 = arith.addf %65, %68 : vector<1x128xf32>
    %c2_36 = arith.constant 2 : index
    %70 = memref.load %arg5[%c2_36] : memref<3xf32, #tpu.memory_space<smem>>
    %71 = vector.broadcast %70 : f32 to vector<1x128xf32>
    %72 = arith.addf %69, %71 : vector<1x128xf32>
    %c2_37 = arith.constant 2 : index
    %c0_38 = arith.constant 0 : index
    %73 = vector.load %arg6[%c2_37, %c0_38] : memref<3x128xf32, #tpu.memory_space<vmem>>, vector<1x128xf32>
    tpu.vector_store %arg6[%c2_37, %c0_38], %72 {strides = array<i32>} : memref<3x128xf32, #tpu.memory_space<vmem>>, vector<1x128xf32>,
    return
  }
  func.func @transform_0(%arg0: i32) -> (i32, i32) {
    %c0_i32 = arith.constant 0 : i32
    %c0_i32_0 = arith.constant 0 : i32
    return %c0_i32, %arg0 : i32, i32
  }
  func.func @transform_1(%arg0: i32) -> (i32, i32) {
    %c0_i32 = arith.constant 0 : i32
    %c0_i32_0 = arith.constant 0 : i32
    %c0_i32_1 = arith.constant 0 : i32
    return %c0_i32, %c0_i32_0 : i32, i32
  }
  func.func @transform_2(%arg0: i32) -> i32 {
    %c0_i32 = arith.constant 0 : i32
    %c0_i32_0 = arith.constant 0 : i32
    return %c0_i32 : i32
  }
  func.func @transform_3(%arg0: i32) -> (i32, i32) {
    %c0_i32 = arith.constant 0 : i32
    %c0_i32_0 = arith.constant 0 : i32
    %c0_i32_1 = arith.constant 0 : i32
    return %c0_i32, %c0_i32_0 : i32, i32
  }
  func.func @transform_4(%arg0: i32) -> i32 {
    %c0_i32 = arith.constant 0 : i32
    %c0_i32_0 = arith.constant 0 : i32
    return %c0_i32 : i32
  }
  func.func @transform_5(%arg0: i32) -> (i32, i32) {
    %c0_i32 = arith.constant 0 : i32
    %c0_i32_0 = arith.constant 0 : i32
    return %c0_i32, %arg0 : i32, i32
  }
}

</mosaic_0001>

<bundles_post_ra>
// kernel: tpu_custom_call.1
= control target key start
LH: loop header
LB: loop body
LE: loop exit
PB: predicated region body
PF: predicated region fallthrough
CT: control target
= control target key end

     0   :  { %10 = vsyncpa [#allocation4], 0  ;;  %s336_s0 = inlined_call_operand.vmem [shape: f32[3,128], index: 0, kind: input, shape index: {}]   ;;  %s337_s1 = inlined_call_operand.vmem [shape: f32[2,3], index: 1, kind: input, shape index: {}]   ;;  %s338_s2 = inlined_call_operand.vmem [shape: f32[2], index: 2, kind: input, shape index: {}]   ;;  %s339_s3 = inlined_call_operand.vmem [shape: f32[3,2], index: 3, kind: input, shape index: {}]   ;;  %s340_s4 = inlined_call_operand.vmem [shape: f32[3], index: 4, kind: input, shape index: {}]   ;;  %s341_s5 = inlined_call_operand.hbm [shape: f32[3,128], index: 5, kind: output, shape index: {}]  }
   0x1   :  { %11 = vsyncpa [#allocation6], 0 }
   0x2   :  { %12 = vsyncpa [#allocation9], 0  ;;  %s32_s20 = sshll.u32 %s338_s2, 4  ;;  %s33_s20 = int_to_ptr.vmem [resolvable:$true] %s32_s20 }
   0x3   :  { %13 = vsyncpa [#allocation3], 0  ;;  %s22_s23 = sshll.u32 %s337_s1, 4  ;;  %s190_s24 = scalar_lea.vmem %s33_s20, 16  ;;  %s23_s23 = int_to_ptr.vmem [resolvable:$true] %s22_s23 }
   0x4   :  { %p191_p0 = scmp.ne.s32.totalorder %s33_s20, %s190_s24  ;;  %p195_p1 = scmp.lt.s32.totalorder %s33_s20, %s33_s20 }
   0x5   :  { %p196_p2 = scmp.lt.s32.totalorder %s190_s24, %s190_s24 }
   0x7   :  { %p197_p3 = por %p196_p2, %p195_p1 }
   0x9   :  { %p198_p4 = pnand %p197_p3, %p191_p0 }
   0xb   :  { %201 = shalt.err (!%p198_p4)
}
   0xc   :  { %s268_s25 = smov [#allocation5]   ;;  %s202_s26 = scalar_lea.vmem %s23_s23, 32 }
   0xd   :  { %35 = dma.vmem_to_smem %s33_s20, 16, %s268_s25, [#allocation6]  }
   0xe   :  { %p203_p5 = scmp.ne.s32.totalorder %s23_s23, %s202_s26  ;;  %p207_p6 = scmp.lt.s32.totalorder %s23_s23, %s23_s23 }
   0xf   :  { %p208_p7 = scmp.lt.s32.totalorder %s202_s26, %s202_s26 }
  0x11   :  { %p209_p8 = por %p208_p7, %p207_p6 }
  0x13   :  { %p210_p9 = pnand %p209_p8, %p203_p5 }
  0x15   :  { %213 = shalt.err (!%p210_p9)
}
  0x16   :  { %s269_s2 = smov [#allocation2]   ;;  %s42_s28 = sshll.u32 %s339_s3, 4  ;;  %s43_s28 = int_to_ptr.vmem [resolvable:$true] %s42_s28 }
  0x17   :  { %25 = dma.vmem_to_smem %s23_s23, 32, %s269_s2, [#allocation4]  }
  0x18   :  { %s52_s6 = sshll.u32 %s340_s4, 4  ;;  %s214_s7 = scalar_lea.vmem %s43_s28, 64  ;;  %s53_s6 = int_to_ptr.vmem [resolvable:$true] %s52_s6 }
  0x19   :  { %p215_p10 = scmp.ne.s32.totalorder %s43_s28, %s214_s7  ;;  %p219_p11 = scmp.lt.s32.totalorder %s43_s28, %s43_s28 }
  0x1a   :  { %p220_p12 = scmp.lt.s32.totalorder %s214_s7, %s214_s7 }
  0x1c   :  { %p221_p13 = por %p220_p12, %p219_p11 }
  0x1e   :  { %p222_p0 = pnand %p221_p13, %p215_p10 }
  0x20   :  { %225 = shalt.err (!%p222_p0)
}
  0x21   :  { %s270_s8 = smov [#allocation7]   ;;  %s226_s9 = scalar_lea.vmem %s53_s6, 16 }
  0x22   :  { %45 = dma.vmem_to_smem %s43_s28, 64, %s270_s8, [#allocation6]  }
  0x23   :  { %p227_p1 = scmp.ne.s32.totalorder %s53_s6, %s226_s9  ;;  %p231_p2 = scmp.lt.s32.totalorder %s53_s6, %s53_s6 }
  0x24   :  { %p232_p3 = scmp.lt.s32.totalorder %s226_s9, %s226_s9 }
  0x26   :  { %p233_p4 = por %p232_p3, %p231_p2 }
  0x28   :  { %p234_p5 = pnand %p233_p4, %p227_p1 }
  0x2a   :  { %237 = shalt.err (!%p234_p5)
}
  0x2b   :  { %s271_s3 = smov [#allocation8]  }
  0x2c   :  { %55 = dma.vmem_to_smem %s53_s6, 16, %s271_s3, [#allocation9]  }
  0x2d   :  { %260 = dma.done.wait [#allocation4], 32  }
  0x2e   :  { %261 = vsyncadd [#allocation4], 4294967264 }
  0x2f   :  { %262 = dma.done.wait [#allocation6], 80  }
  0x30   :  { %263 = vsyncadd [#allocation6], 4294967216 }
  0x31   :  { %264 = dma.done.wait [#allocation9], 16  }
  0x32   :  { %265 = vsyncadd [#allocation9], 4294967280 }
  0x33   :  { %68 = sfence }
  0x34   :  { %s72_s4 = sld [smem:[#allocation2]]  ;;  %s162_s10 = sld [smem:[#allocation2 + $0x1]]  ;;  %v69_v0 = vld [vmem:[%s336_s0] sm:$0x1]  ;;  %v70_v1 = vld [vmem:[%s336_s0 + $0x1] sm:$0x1] }
  0x35   :  { %s163_s11 = sld [smem:[#allocation2 + $0x2]]  ;;  %s83_s12 = sld [smem:[#allocation5]]  ;;  %v71_v2 = vld [vmem:[%s336_s0 + $0x2] sm:$0x1] }
  0x36   :  { %s165_s13 = sld [smem:[#allocation2 + $0x80]]  ;;  %s166_s14 = sld [smem:[#allocation2 + $0x81]] }
  0x37   :  { %s167_s15 = sld [smem:[#allocation2 + $0x82]]  ;;  %s168_s20 = sld [smem:[#allocation5 + $0x1]] }
  0x38   :  { %s112_s0 = sld [smem:[#allocation7]]  ;;  %s170_s25 = sld [smem:[#allocation7 + $0x1]] }
  0x39   :  { %s171_s23 = sld [smem:[#allocation7 + $0x80]]  ;;  %s172_s26 = sld [smem:[#allocation7 + $0x81]] }
  0x3a   :  { %v73_v3 = vstv %s72_s4  ;;  %v76_v4 = vstv %s162_s10  ;;  %s174_s24 = sld [smem:[#allocation7 + $0x100]]  ;;  %s175_s2 = sld [smem:[#allocation7 + $0x101]] }
  0x3b   :  { %v74_v5 = vmul.f32 %v73_v3, %v69_v0  ;;  %v77_v6 = vmul.f32 %v76_v4, %v70_v1  ;;  %v80_v7 = vstv %s163_s11  ;;  %v84_v15 = vstv %s83_s12  ;;  %s119_s1 = sld [smem:[#allocation8]]  ;;  %s173_s27 = sld [smem:[#allocation8 + $0x1]] }
  0x3c   :  { %v81_v8 = vmul.f32 %v80_v7, %v71_v2  ;;  %v93_v9 = vstv %s165_s13  ;;  %v96_v10 = vstv %s166_s14  ;;  %s176_s28 = sld [smem:[#allocation8 + $0x2]]  ;;  %s272_s29 = smov [#allocation10]  }
  0x3d   :  { %v78_v11 = vadd.f32 %v77_v6, %v74_v5  ;;  %v94_v12 = vmul.f32 %v93_v9, %v69_v0  ;;  %v97_v13 = vmul.f32 %v96_v10, %v70_v1  ;;  %v100_v14 = vstv %s167_s15  ;;  %s151_s30 = sshll.u32 %s272_s29, 4  ;;  %s152_s30 = int_to_ptr.vmem [resolvable:$true] %s151_s30 }
  0x3e   :  { %v101_v16 = vmul.f32 %v100_v14, %v71_v2  ;;  %v104_v19 = vstv %s168_s20  ;;  %v113_v29 = vstv %s112_s0  ;;  %v116_v33 = vstv %s170_s25  ;;  %s238_s6 = scalar_lea.vmem %s152_s30, 64  ;;  %p243_p7 = scmp.lt.s32.totalorder %s152_s30, %s152_s30 }
  0x3f   :  { %v82_v17 = vadd.f32 %v81_v8, %v78_v11  ;;  %v98_v18 = vadd.f32 %v97_v13, %v94_v12  ;;  %v124_v30 = vstv %s171_s23  ;;  %v127_v34 = vstv %s172_s26  ;;  %p239_p6 = scmp.ne.s32.totalorder %s152_s30, %s238_s6  ;;  %p244_p8 = scmp.lt.s32.totalorder %s238_s6, %s238_s6 }
  0x40   :  { %v135_v31 = vstv %s174_s24  ;;  %v138_v35 = vstv %s175_s2 }
  0x41   :  { %v85_v20 = vadd.f32 %v84_v15, %v82_v17  ;;  %v102_v21 = vadd.f32 %v101_v16, %v98_v18  ;;  %v120_v43 = vstv %s119_s1  ;;  %v131_v44 = vstv %s173_s27  ;;  %p245_p9 = por %p244_p8, %p243_p7 }
  0x42   :  { %v142_v45 = vstv %s176_s28 }
  0x43   :  { %v164_v22 = vmul.f32 -1.442695, %v85_v20  ;;  %v105_v23 = vadd.f32 %v104_v19, %v102_v21  ;;  %p246_p10 = pnand %p245_p9, %p239_p6 }
  0x45   :  { %182 = vpow2.f32 %v164_v22  ;;  %v169_v24 = vmul.f32 -1.442695, %v105_v23 }
  0x47   :  { %184 = vpow2.f32 %v169_v24 }
  0x4f   :  { %v183_v25 = vpop.eup %182 }
  0x50   :  { %v89_v26 = vadd.f32 1.0, %v183_v25 }
  0x51   :  { %v185_v27 = vpop.eup %184 }
  0x52   :  { %186 = vrcp.f32 %v89_v26  ;;  %v109_v28 = vadd.f32 1.0, %v185_v27 }
  0x54   :  { %188 = vrcp.f32 %v109_v28 }
  0x5c   :  { %v187_v32 = vpop.eup %186 }
  0x5d   :  { %v114_v36 = vmul.f32 %v187_v32, %v113_v29  ;;  %v125_v37 = vmul.f32 %v187_v32, %v124_v30  ;;  %v136_v38 = vmul.f32 %v187_v32, %v135_v31 }
  0x5e   :  { %v189_v39 = vpop.eup %188 }
  0x5f   :  { %v117_v40 = vmul.f32 %v189_v39, %v116_v33  ;;  %v128_v41 = vmul.f32 %v189_v39, %v127_v34  ;;  %v139_v42 = vmul.f32 %v189_v39, %v138_v35 }
  0x61   :  { %v118_v46 = vadd.f32 %v117_v40, %v114_v36  ;;  %v129_v47 = vadd.f32 %v128_v41, %v125_v37  ;;  %v140_v48 = vadd.f32 %v139_v42, %v136_v38 }
  0x63   :  { %v121_v49 = vadd.f32 %v120_v43, %v118_v46  ;;  %v132_v50 = vadd.f32 %v131_v44, %v129_v47  ;;  %v143_v51 = vadd.f32 %v142_v45, %v140_v48 }
  0x65   :  { %122 = vst [vmem:[#allocation10] sm:$0x1] %v121_v49  ;;  %133 = vst [vmem:[#allocation10 + $0x1] sm:$0x1] %v132_v50 }
  0x66   :  { %144 = vst [vmem:[#allocation10 + $0x2] sm:$0x1] %v143_v51 }
  0x67   :  { %249 = shalt.err (!%p246_p10)
}
  0x68   :  { %s250_s9 = scalar_lea.hbm %s341_s5, 64 }
  0x69   :  { %p251_p11 = scmp.ne.s32.totalorder %s341_s5, %s250_s9  ;;  %p254_p12 = scmp.lt.u32.totalorder %s250_s9, %s341_s5 }
  0x6b   :  { %p256_p13 = pnand %p254_p12, %p251_p11 }
  0x6d   :  { %259 = shalt.err (!%p256_p13)
}
  0x6e   :  { %154 = dma.vmem_to_hbm [thread:$0]  %s152_s30, 64, %s341_s5, [#allocation3]  }
  0x6f   :  { %266 = dma.done.wait [#allocation3], 64  }
  0x70   :  { %267 = vsyncadd [#allocation3], 4294967232 }
  0x71   :  { %158 = vsyncpa [#allocation3], 1 }
  0x72   :  { %159 = vsyncpa [#allocation4], 1 }
  0x73   :  { %160 = vsyncpa [#allocation6], 1 }
  0x74   :  { %161 = vsyncpa [#allocation9], 1 }

</bundles_post_ra>
